<compile_context>
chip_gen: v7x
topology: tpu7x:2x2x1
jax: 0.10.0
libtpu: 0.0.40
codegen_flags: <defaults>
</compile_context>

<pallas_src>
import numpy as np

import jax
import jax.numpy as jnp
from jax.experimental import pallas as pl
from jax.experimental.pallas import tpu as pltpu


# ----------------------------- helpers --------------------------------------

def _round_up(x, m):
    return (x + m - 1) // m * m


def _pad2d(x, rows, cols):
    x = jnp.asarray(x)
    return jnp.zeros((rows, cols), x.dtype).at[:x.shape[0], :x.shape[1]].set(x)


# ----------------------------- fused Pallas kernel --------------------------

def _make_mpn_kernel(depth):
    """Entire MPN forward in one kernel; all operands stay resident in VMEM."""

    def kernel(fb0_ref, fb1_ref, fa_ref, a0_ref, a1_ref, g0_ref, g1_ref,
               pm_ref, inv_ref, wi_ref, wh_ref, woa_ref, wom_ref, bo_ref,
               out_ref):
        bf16 = jnp.bfloat16

        def mm(x, y):  # MXU matmul: bf16 operands, f32 accumulation
            return jnp.dot(x, y, preferred_element_type=jnp.float32)

        wi = wi_ref[...]
        wh = wh_ref[...]
        a0 = a0_ref[...]
        a1 = a1_ref[...]
        g0 = g0_ref[...]
        g1 = g1_ref[...]

        # input = relu(W_i(f_bonds))          (bias=False -> no bias add)
        inp0 = jnp.maximum(mm(fb0_ref[...], wi), 0.0)
        inp1 = jnp.maximum(mm(fb1_ref[...], wi), 0.0)

        # depth-1 message-passing steps, fully unrolled (depth is small and
        # static); the two message halves stay live in vregs / VMEM.
        m0, m1 = inp0, inp1
        for _ in range(depth - 1):
            m0b = m0.astype(bf16)
            m1b = m1.astype(bf16)
            # a_message[a] = sum of incoming bond messages (segment sum on MXU)
            amsg = (mm(a0, m0b) + mm(a1, m1b)).astype(bf16)
            # message_new = a_message[b2a] - message[b2revb]; the reverse-bond
            # gather is simply the opposite half of each bond pair.
            new0 = mm(g0, amsg) - m1
            new1 = mm(g1, amsg) - m0
            m0 = jnp.maximum(inp0 + mm(new0.astype(bf16), wh), 0.0)
            m1 = jnp.maximum(inp1 + mm(new1.astype(bf16), wh), 0.0)
            # TODO(synk): message_dropout is modeled as eval-mode identity.

        # readout: atom_hiddens = relu([f_atoms, a_message] @ W_o + b_o)
        amsg = mm(a0, m0.astype(bf16)) + mm(a1, m1.astype(bf16))
        atom_h = jnp.maximum(
            mm(fa_ref[...], woa_ref[...])
            + mm(amsg.astype(bf16), wom_ref[...])
            + bo_ref[...],
            0.0)
        # per-molecule mean pooling: 0/1 membership matmul, f32 1/size scale
        out_ref[...] = mm(pm_ref[...], atom_h.astype(bf16)) * inv_ref[...]

    return kernel


# ----------------------------- MPN forward (host-side glue) -----------------

def mpn_forward(params, f_atoms, f_bonds, a2b, b2a, b2revb, a_scope, depth):
    """Chemprop MPNEncoder forward (atom_messages=False, eval mode)."""
    n_atoms, atom_fdim = f_atoms.shape
    n_bonds, bond_fdim = f_bonds.shape
    hidden = params["W_i"].shape[1]
    n_mols = len(a_scope)

    # chemprop paired directed-bond layout: bond 0 is padding, bonds (2p+1,
    # 2p+2) are mutual reverses.  The kernel relies on it to make the
    # reverse-bond gather free; verify the supplied b2revb matches.
    n_pairs = (n_bonds - 1) // 2
    rev_np = np.asarray(b2revb)
    expect = np.zeros(n_bonds, np.int64)
    expect[1::2] = 2 * np.arange(n_pairs) + 2
    expect[2::2] = 2 * np.arange(n_pairs) + 1
    if n_bonds != 2 * n_pairs + 1 or not np.array_equal(rev_np, expect):
        raise ValueError("b2revb must follow chemprop's paired directed-bond layout")

    # padded sizes: lane dims (features / hidden) -> multiples of 128,
    # row counts -> multiples of 16 (bf16 sublane-packing friendly).
    PP = _round_up(max(n_pairs, 1), 16)
    AA = _round_up(n_atoms, 16)
    MM = _round_up(max(n_mols, 1), 16)
    HH = _round_up(hidden, 128)
    FA = _round_up(atom_fdim, 128)
    FB = _round_up(bond_fdim, 128)

    bf16, f32 = jnp.bfloat16, jnp.float32

    # split directed bonds into the two halves of each reverse pair
    fb0 = f_bonds[1::2]                       # old bonds 1,3,5,...  (n_pairs, Fb)
    fb1 = f_bonds[2::2]                       # old bonds 2,4,6,...
    b2a = jnp.asarray(b2a)
    pair_ids = jnp.arange(n_pairs)
    g0 = jnp.zeros((PP, AA), f32).at[pair_ids, b2a[1::2]].set(1.0)  # a_msg -> half 0
    g1 = jnp.zeros((PP, AA), f32).at[pair_ids, b2a[2::2]].set(1.0)  # a_msg -> half 1

    # segment-sum routing a_message[a] = sum_k message[a2b[a,k]] as count
    # matrices over (atom, pair) per half; small exact ints -> bf16 lossless.
    a2b = jnp.asarray(a2b)
    valid = a2b > 0                           # index 0 == padding bond (zero message)
    pair = jnp.where(valid, (a2b - 1) // 2, 0)
    half = (a2b - 1) % 2
    rows = jnp.arange(n_atoms)[:, None]
    a0 = jnp.zeros((AA, PP), f32).at[rows, pair].add((valid & (half == 0)).astype(f32))
    a1 = jnp.zeros((AA, PP), f32).at[rows, pair].add((valid & (half == 1)).astype(f32))

    # per-molecule mean pooling: 0/1 membership + f32 1/a_size column
    # (vectorized construction, empty molecules -> zero row -> zero vector).
    starts = np.zeros((MM,), np.int64)
    sizes = np.zeros((MM,), np.int64)
    for i, (a_start, a_size) in enumerate(a_scope):
        starts[i], sizes[i] = a_start, a_size
    atom_ids = np.arange(AA)[None, :]
    pmat = (atom_ids >= starts[:, None]) & (atom_ids < (starts + sizes)[:, None])
    inv_sz = np.where(sizes > 0, 1.0 / np.maximum(sizes, 1), 0.0)[:, None]

    # zero-pad and cast matmul operands to bf16 (f32 accumulation in-kernel)
    fb0p = _pad2d(fb0, PP, FB).astype(bf16)
    fb1p = _pad2d(fb1, PP, FB).astype(bf16)
    fap = _pad2d(f_atoms, AA, FA).astype(bf16)
    a0p, a1p = a0.astype(bf16), a1.astype(bf16)
    g0p, g1p = g0.astype(bf16), g1.astype(bf16)
    pmp = jnp.asarray(pmat, bf16)
    inv = jnp.asarray(inv_sz, f32)
    wi = _pad2d(params["W_i"], FB, HH).astype(bf16)
    wh = _pad2d(params["W_h"], HH, HH).astype(bf16)
    woa = _pad2d(params["W_o_atom"], FA, HH).astype(bf16)
    wom = _pad2d(params["W_o_msg"], HH, HH).astype(bf16)
    bo = _pad2d(params["b_o"], 1, HH)                       # stays f32

    vmem = pl.BlockSpec(memory_space=pltpu.MemorySpace.VMEM)
    # TODO(synk): for large batches where routing matrices / messages exceed
    # VMEM, switch to a tiled grid ("parallel" row tiles + scalar-prefetch row
    # gathers) instead of the whole-array VMEM blocks used here.
    out = pl.pallas_call(
        _make_mpn_kernel(depth),
        out_shape=jax.ShapeDtypeStruct((MM, HH), f32),
        in_specs=[vmem] * 14,
        out_specs=vmem,
        compiler_params=pltpu.CompilerParams(
            vmem_limit_bytes=32 * 1024 * 1024),
    )(fb0p, fb1p, fap, a0p, a1p, g0p, g1p, pmp, inv, wi, wh, woa, wom, bo)

    return out[:n_mols, :hidden]


# ----------------------------- parameter init -------------------------------

def init_params(key, atom_fdim, bond_fdim, hidden):
    ks = jax.random.split(key, 4)

    def lin(k, fan_in, fan_out):
        bound = 1.0 / float(np.sqrt(fan_in))
        return jax.random.uniform(k, (fan_in, fan_out), jnp.float32, -bound, bound)

    w_o = lin(ks[2], atom_fdim + hidden, hidden)
    bound_o = 1.0 / float(np.sqrt(atom_fdim + hidden))
    return {
        # args.bias = False -> W_i / W_h have no bias (dropped in the kernel)
        "W_i": lin(ks[0], bond_fdim, hidden),
        "W_h": lin(ks[1], hidden, hidden),
        "W_o_atom": w_o[:atom_fdim, :],
        "W_o_msg": w_o[atom_fdim:, :],
        "b_o": jax.random.uniform(ks[3], (1, hidden), jnp.float32,
                                  -bound_o, bound_o),
    }


# ----------------------------- main ------------------------------------------

if __name__ == "__main__":
    key = jax.random.PRNGKey(0)
    k_feat_a, k_feat_b, k_a2b, k_b2a, k_param = jax.random.split(key, 5)

    atom_fdim = 16
    bond_fdim_raw = 8
    bond_fdim = bond_fdim_raw + atom_fdim      # atom_messages=False convention
    hidden = 32
    depth = 3
    max_nb = 6

    n_atoms = 17    # row 0 is the padding atom (all zeros), 16 real atoms
    n_bonds = 25    # row 0 is the padding bond, 24 real bonds = 12 reverse pairs

    f_atoms = jax.random.normal(k_feat_a, (n_atoms, atom_fdim), jnp.float32)
    f_atoms = f_atoms.at[0].set(0.0)
    f_bonds = jax.random.normal(k_feat_b, (n_bonds, bond_fdim), jnp.float32)
    f_bonds = f_bonds.at[0].set(0.0)

    # incoming-bond index table per atom, 0 = padding
    a2b = jax.random.randint(k_a2b, (n_atoms, max_nb), 0, n_bonds)
    a2b = a2b.at[0].set(0)
    # source atom of each bond, padding bond maps to padding atom
    b2a = jax.random.randint(k_b2a, (n_bonds,), 1, n_atoms)
    b2a = b2a.at[0].set(0)
    # reverse-bond permutation (chemprop layout): bond 0 -> 0, then (1,2), (3,4), ...
    b2revb = [0]
    for k in range(1, n_bonds, 2):
        b2revb += [k + 1, k]
    b2revb = jnp.asarray(b2revb, jnp.int32)

    # two molecules: atoms 1..8 and 9..16
    a_scope = [(1, 8), (9, 8)]

    params = init_params(k_param, atom_fdim, bond_fdim, hidden)

    mol_vecs = mpn_forward(params, f_atoms, f_bonds, a2b, b2a, b2revb,
                           a_scope, depth)
    mol_vecs = jax.block_until_ready(mol_vecs)

    assert mol_vecs.shape == (len(a_scope), hidden)
    assert bool(jnp.all(jnp.isfinite(mol_vecs)))
    print("KERNEL_OK")
</pallas_src>

<mosaic_0001>
module attributes {stable_mosaic.version = 11 : i64} {
  func.func @kernel(%arg0: memref<16x128xbf16, #tpu.memory_space<vmem>>, %arg1: memref<16x128xbf16, #tpu.memory_space<vmem>>, %arg2: memref<32x128xbf16, #tpu.memory_space<vmem>>, %arg3: memref<32x16xbf16, #tpu.memory_space<vmem>>, %arg4: memref<32x16xbf16, #tpu.memory_space<vmem>>, %arg5: memref<16x32xbf16, #tpu.memory_space<vmem>>, %arg6: memref<16x32xbf16, #tpu.memory_space<vmem>>, %arg7: memref<16x32xbf16, #tpu.memory_space<vmem>>, %arg8: memref<16x1xf32, #tpu.memory_space<vmem>>, %arg9: memref<128x128xbf16, #tpu.memory_space<vmem>>, %arg10: memref<128x128xbf16, #tpu.memory_space<vmem>>, %arg11: memref<128x128xbf16, #tpu.memory_space<vmem>>, %arg12: memref<128x128xbf16, #tpu.memory_space<vmem>>, %arg13: memref<1x128xf32, #tpu.memory_space<vmem>>, %arg14: memref<16x128xf32, #tpu.memory_space<vmem>>) attributes {dimension_semantics = [], scalar_prefetch = 0 : i64, scratch_operands = 0 : i64, tpu.core_type = #tpu.core_type<tc>} {
    %c0 = arith.constant 0 : index
    %c0_0 = arith.constant 0 : index
    %0 = vector.load %arg9[%c0, %c0_0] : memref<128x128xbf16, #tpu.memory_space<vmem>>, vector<128x128xbf16>
    %c0_1 = arith.constant 0 : index
    %c0_2 = arith.constant 0 : index
    %1 = vector.load %arg10[%c0_1, %c0_2] : memref<128x128xbf16, #tpu.memory_space<vmem>>, vector<128x128xbf16>
    %c0_3 = arith.constant 0 : index
    %c0_4 = arith.constant 0 : index
    %2 = vector.load %arg3[%c0_3, %c0_4] : memref<32x16xbf16, #tpu.memory_space<vmem>>, vector<32x16xbf16>
    %c0_5 = arith.constant 0 : index
    %c0_6 = arith.constant 0 : index
    %3 = vector.load %arg4[%c0_5, %c0_6] : memref<32x16xbf16, #tpu.memory_space<vmem>>, vector<32x16xbf16>
    %c0_7 = arith.constant 0 : index
    %c0_8 = arith.constant 0 : index
    %4 = vector.load %arg5[%c0_7, %c0_8] : memref<16x32xbf16, #tpu.memory_space<vmem>>, vector<16x32xbf16>
    %c0_9 = arith.constant 0 : index
    %c0_10 = arith.constant 0 : index
    %5 = vector.load %arg6[%c0_9, %c0_10] : memref<16x32xbf16, #tpu.memory_space<vmem>>, vector<16x32xbf16>
    %c0_11 = arith.constant 0 : index
    %c0_12 = arith.constant 0 : index
    %6 = vector.load %arg0[%c0_11, %c0_12] : memref<16x128xbf16, #tpu.memory_space<vmem>>, vector<16x128xbf16>
    %cst = arith.constant dense<0.000000e+00> : vector<16x128xf32>
    %7 = tpu.matmul %6, %0, %cst {dimension_numbers = #tpu.dot_dimension_numbers<[1], [0], [0], [1], [0, 0, 1, 1], [], []>} : vector<16x128xbf16>, vector<128x128xbf16>, vector<16x128xf32> -> vector<16x128xf32>
    %cst_13 = arith.constant 0.000000e+00 : f32
    %8 = vector.broadcast %cst_13 : f32 to vector<16x128xf32>
    %9 = arith.maximumf %7, %8 : vector<16x128xf32>
    %c0_14 = arith.constant 0 : index
    %c0_15 = arith.constant 0 : index
    %10 = vector.load %arg1[%c0_14, %c0_15] : memref<16x128xbf16, #tpu.memory_space<vmem>>, vector<16x128xbf16>
    %cst_16 = arith.constant dense<0.000000e+00> : vector<16x128xf32>
    %11 = tpu.matmul %10, %0, %cst_16 {dimension_numbers = #tpu.dot_dimension_numbers<[1], [0], [0], [1], [0, 0, 1, 1], [], []>} : vector<16x128xbf16>, vector<128x128xbf16>, vector<16x128xf32> -> vector<16x128xf32>
    %cst_17 = arith.constant 0.000000e+00 : f32
    %12 = vector.broadcast %cst_17 : f32 to vector<16x128xf32>
    %13 = arith.maximumf %11, %12 : vector<16x128xf32>
    %14 = arith.truncf %9 : vector<16x128xf32> to vector<16x128xbf16>
    %15 = arith.truncf %13 : vector<16x128xf32> to vector<16x128xbf16>
    %cst_18 = arith.constant dense<0.000000e+00> : vector<32x128xf32>
    %16 = tpu.matmul %2, %14, %cst_18 {dimension_numbers = #tpu.dot_dimension_numbers<[1], [0], [0], [1], [0, 0, 1, 1], [], []>} : vector<32x16xbf16>, vector<16x128xbf16>, vector<32x128xf32> -> vector<32x128xf32>
    %cst_19 = arith.constant dense<0.000000e+00> : vector<32x128xf32>
    %17 = tpu.matmul %3, %15, %cst_19 {dimension_numbers = #tpu.dot_dimension_numbers<[1], [0], [0], [1], [0, 0, 1, 1], [], []>} : vector<32x16xbf16>, vector<16x128xbf16>, vector<32x128xf32> -> vector<32x128xf32>
    %18 = arith.addf %16, %17 : vector<32x128xf32>
    %19 = arith.truncf %18 : vector<32x128xf32> to vector<32x128xbf16>
    %cst_20 = arith.constant dense<0.000000e+00> : vector<16x128xf32>
    %20 = tpu.matmul %4, %19, %cst_20 {dimension_numbers = #tpu.dot_dimension_numbers<[1], [0], [0], [1], [0, 0, 1, 1], [], []>} : vector<16x32xbf16>, vector<32x128xbf16>, vector<16x128xf32> -> vector<16x128xf32>
    %21 = arith.subf %20, %13 : vector<16x128xf32>
    %cst_21 = arith.constant dense<0.000000e+00> : vector<16x128xf32>
    %22 = tpu.matmul %5, %19, %cst_21 {dimension_numbers = #tpu.dot_dimension_numbers<[1], [0], [0], [1], [0, 0, 1, 1], [], []>} : vector<16x32xbf16>, vector<32x128xbf16>, vector<16x128xf32> -> vector<16x128xf32>
    %23 = arith.subf %22, %9 : vector<16x128xf32>
    %24 = arith.truncf %21 : vector<16x128xf32> to vector<16x128xbf16>
    %cst_22 = arith.constant dense<0.000000e+00> : vector<16x128xf32>
    %25 = tpu.matmul %24, %1, %cst_22 {dimension_numbers = #tpu.dot_dimension_numbers<[1], [0], [0], [1], [0, 0, 1, 1], [], []>} : vector<16x128xbf16>, vector<128x128xbf16>, vector<16x128xf32> -> vector<16x128xf32>
    %26 = arith.addf %9, %25 : vector<16x128xf32>
    %cst_23 = arith.constant 0.000000e+00 : f32
    %27 = vector.broadcast %cst_23 : f32 to vector<16x128xf32>
    %28 = arith.maximumf %26, %27 : vector<16x128xf32>
    %29 = arith.truncf %23 : vector<16x128xf32> to vector<16x128xbf16>
    %cst_24 = arith.constant dense<0.000000e+00> : vector<16x128xf32>
    %30 = tpu.matmul %29, %1, %cst_24 {dimension_numbers = #tpu.dot_dimension_numbers<[1], [0], [0], [1], [0, 0, 1, 1], [], []>} : vector<16x128xbf16>, vector<128x128xbf16>, vector<16x128xf32> -> vector<16x128xf32>
    %31 = arith.addf %13, %30 : vector<16x128xf32>
    %cst_25 = arith.constant 0.000000e+00 : f32
    %32 = vector.broadcast %cst_25 : f32 to vector<16x128xf32>
    %33 = arith.maximumf %31, %32 : vector<16x128xf32>
    %34 = arith.truncf %28 : vector<16x128xf32> to vector<16x128xbf16>
    %35 = arith.truncf %33 : vector<16x128xf32> to vector<16x128xbf16>
    %cst_26 = arith.constant dense<0.000000e+00> : vector<32x128xf32>
    %36 = tpu.matmul %2, %34, %cst_26 {dimension_numbers = #tpu.dot_dimension_numbers<[1], [0], [0], [1], [0, 0, 1, 1], [], []>} : vector<32x16xbf16>, vector<16x128xbf16>, vector<32x128xf32> -> vector<32x128xf32>
    %cst_27 = arith.constant dense<0.000000e+00> : vector<32x128xf32>
    %37 = tpu.matmul %3, %35, %cst_27 {dimension_numbers = #tpu.dot_dimension_numbers<[1], [0], [0], [1], [0, 0, 1, 1], [], []>} : vector<32x16xbf16>, vector<16x128xbf16>, vector<32x128xf32> -> vector<32x128xf32>
    %38 = arith.addf %36, %37 : vector<32x128xf32>
    %39 = arith.truncf %38 : vector<32x128xf32> to vector<32x128xbf16>
    %cst_28 = arith.constant dense<0.000000e+00> : vector<16x128xf32>
    %40 = tpu.matmul %4, %39, %cst_28 {dimension_numbers = #tpu.dot_dimension_numbers<[1], [0], [0], [1], [0, 0, 1, 1], [], []>} : vector<16x32xbf16>, vector<32x128xbf16>, vector<16x128xf32> -> vector<16x128xf32>
    %41 = arith.subf %40, %33 : vector<16x128xf32>
    %cst_29 = arith.constant dense<0.000000e+00> : vector<16x128xf32>
    %42 = tpu.matmul %5, %39, %cst_29 {dimension_numbers = #tpu.dot_dimension_numbers<[1], [0], [0], [1], [0, 0, 1, 1], [], []>} : vector<16x32xbf16>, vector<32x128xbf16>, vector<16x128xf32> -> vector<16x128xf32>
    %43 = arith.subf %42, %28 : vector<16x128xf32>
    %44 = arith.truncf %41 : vector<16x128xf32> to vector<16x128xbf16>
    %cst_30 = arith.constant dense<0.000000e+00> : vector<16x128xf32>
    %45 = tpu.matmul %44, %1, %cst_30 {dimension_numbers = #tpu.dot_dimension_numbers<[1], [0], [0], [1], [0, 0, 1, 1], [], []>} : vector<16x128xbf16>, vector<128x128xbf16>, vector<16x128xf32> -> vector<16x128xf32>
    %46 = arith.addf %9, %45 : vector<16x128xf32>
    %cst_31 = arith.constant 0.000000e+00 : f32
    %47 = vector.broadcast %cst_31 : f32 to vector<16x128xf32>
    %48 = arith.maximumf %46, %47 : vector<16x128xf32>
    %49 = arith.truncf %43 : vector<16x128xf32> to vector<16x128xbf16>
    %cst_32 = arith.constant dense<0.000000e+00> : vector<16x128xf32>
    %50 = tpu.matmul %49, %1, %cst_32 {dimension_numbers = #tpu.dot_dimension_numbers<[1], [0], [0], [1], [0, 0, 1, 1], [], []>} : vector<16x128xbf16>, vector<128x128xbf16>, vector<16x128xf32> -> vector<16x128xf32>
    %51 = arith.addf %13, %50 : vector<16x128xf32>
    %cst_33 = arith.constant 0.000000e+00 : f32
    %52 = vector.broadcast %cst_33 : f32 to vector<16x128xf32>
    %53 = arith.maximumf %51, %52 : vector<16x128xf32>
    %54 = arith.truncf %48 : vector<16x128xf32> to vector<16x128xbf16>
    %cst_34 = arith.constant dense<0.000000e+00> : vector<32x128xf32>
    %55 = tpu.matmul %2, %54, %cst_34 {dimension_numbers = #tpu.dot_dimension_numbers<[1], [0], [0], [1], [0, 0, 1, 1], [], []>} : vector<32x16xbf16>, vector<16x128xbf16>, vector<32x128xf32> -> vector<32x128xf32>
    %56 = arith.truncf %53 : vector<16x128xf32> to vector<16x128xbf16>
    %cst_35 = arith.constant dense<0.000000e+00> : vector<32x128xf32>
    %57 = tpu.matmul %3, %56, %cst_35 {dimension_numbers = #tpu.dot_dimension_numbers<[1], [0], [0], [1], [0, 0, 1, 1], [], []>} : vector<32x16xbf16>, vector<16x128xbf16>, vector<32x128xf32> -> vector<32x128xf32>
    %58 = arith.addf %55, %57 : vector<32x128xf32>
    %c0_36 = arith.constant 0 : index
    %c0_37 = arith.constant 0 : index
    %59 = vector.load %arg2[%c0_36, %c0_37] : memref<32x128xbf16, #tpu.memory_space<vmem>>, vector<32x128xbf16>
    %c0_38 = arith.constant 0 : index
    %c0_39 = arith.constant 0 : index
    %60 = vector.load %arg11[%c0_38, %c0_39] : memref<128x128xbf16, #tpu.memory_space<vmem>>, vector<128x128xbf16>
    %cst_40 = arith.constant dense<0.000000e+00> : vector<32x128xf32>
    %61 = tpu.matmul %59, %60, %cst_40 {dimension_numbers = #tpu.dot_dimension_numbers<[1], [0], [0], [1], [0, 0, 1, 1], [], []>} : vector<32x128xbf16>, vector<128x128xbf16>, vector<32x128xf32> -> vector<32x128xf32>
    %62 = arith.truncf %58 : vector<32x128xf32> to vector<32x128xbf16>
    %c0_41 = arith.constant 0 : index
    %c0_42 = arith.constant 0 : index
    %63 = vector.load %arg12[%c0_41, %c0_42] : memref<128x128xbf16, #tpu.memory_space<vmem>>, vector<128x128xbf16>
    %cst_43 = arith.constant dense<0.000000e+00> : vector<32x128xf32>
    %64 = tpu.matmul %62, %63, %cst_43 {dimension_numbers = #tpu.dot_dimension_numbers<[1], [0], [0], [1], [0, 0, 1, 1], [], []>} : vector<32x128xbf16>, vector<128x128xbf16>, vector<32x128xf32> -> vector<32x128xf32>
    %65 = arith.addf %61, %64 : vector<32x128xf32>
    %c0_44 = arith.constant 0 : index
    %c0_45 = arith.constant 0 : index
    %66 = vector.load %arg13[%c0_44, %c0_45] : memref<1x128xf32, #tpu.memory_space<vmem>>, vector<1x128xf32>
    %67 = vector.broadcast %66 : vector<1x128xf32> to vector<32x128xf32>
    %68 = arith.addf %65, %67 : vector<32x128xf32>
    %cst_46 = arith.constant 0.000000e+00 : f32
    %69 = vector.broadcast %cst_46 : f32 to vector<32x128xf32>
    %70 = arith.maximumf %68, %69 : vector<32x128xf32>
    %c0_47 = arith.constant 0 : index
    %c0_48 = arith.constant 0 : index
    %71 = vector.load %arg7[%c0_47, %c0_48] : memref<16x32xbf16, #tpu.memory_space<vmem>>, vector<16x32xbf16>
    %72 = arith.truncf %70 : vector<32x128xf32> to vector<32x128xbf16>
    %cst_49 = arith.constant dense<0.000000e+00> : vector<16x128xf32>
    %73 = tpu.matmul %71, %72, %cst_49 {dimension_numbers = #tpu.dot_dimension_numbers<[1], [0], [0], [1], [0, 0, 1, 1], [], []>} : vector<16x32xbf16>, vector<32x128xbf16>, vector<16x128xf32> -> vector<16x128xf32>
    %c0_50 = arith.constant 0 : index
    %c0_51 = arith.constant 0 : index
    %74 = vector.load %arg8[%c0_50, %c0_51] : memref<16x1xf32, #tpu.memory_space<vmem>>, vector<16x1xf32>
    %75 = vector.broadcast %74 : vector<16x1xf32> to vector<16x128xf32>
    %76 = arith.mulf %73, %75 : vector<16x128xf32>
    %c0_52 = arith.constant 0 : index
    %c0_53 = arith.constant 0 : index
    %77 = vector.load %arg14[%c0_52, %c0_53] : memref<16x128xf32, #tpu.memory_space<vmem>>, vector<16x128xf32>
    tpu.vector_store %arg14[%c0_52, %c0_53], %76 {strides = array<i32>} : memref<16x128xf32, #tpu.memory_space<vmem>>, vector<16x128xf32>,
    return
  }
}

</mosaic_0001>

<bundles_post_ra>
// kernel: tpu_custom_call.1
= control target key start
LH: loop header
LB: loop body
LE: loop exit
PB: predicated region body
PF: predicated region fallthrough
CT: control target
= control target key end

     0   :  { %19 = vsyncpa [#allocation3], 0  ;;  %s2567_s0 = inlined_call_operand.vmem [shape: bf16[16,128], index: 0, kind: input, shape index: {}]   ;;  %s2568_s1 = inlined_call_operand.vmem [shape: bf16[16,128], index: 1, kind: input, shape index: {}]   ;;  %s2569_s2 = inlined_call_operand.vmem [shape: bf16[32,128], index: 2, kind: input, shape index: {}]   ;;  %s2570_s3 = inlined_call_operand.vmem [shape: bf16[32,16], index: 3, kind: input, shape index: {}]   ;;  %s2571_s4 = inlined_call_operand.vmem [shape: bf16[32,16], index: 4, kind: input, shape index: {}]   ;;  %s2572_s5 = inlined_call_operand.hbm [shape: bf16[16,32], index: 5, kind: input, shape index: {}]   ;;  %s2573_s6 = inlined_call_operand.hbm [shape: bf16[16,32], index: 6, kind: input, shape index: {}]   ;;  %s2574_s7 = inlined_call_operand.hbm [shape: bf16[16,32], index: 7, kind: input, shape index: {}]   ;;  %s2575_s8 = inlined_call_operand.vmem [shape: f32[16,1], index: 8, kind: input, shape index: {}]   ;;  %s2576_s9 = inlined_call_operand.vmem [shape: bf16[128,128], index: 9, kind: input, shape index: {}]   ;;  %s2577_s10 = inlined_call_operand.hbm [shape: bf16[128,128], index: 10, kind: input, shape index: {}]   ;;  %s2578_s11 = inlined_call_operand.hbm [shape: bf16[128,128], index: 11, kind: input, shape index: {}]   ;;  %s2579_s12 = inlined_call_operand.hbm [shape: bf16[128,128], index: 12, kind: input, shape index: {}]   ;;  %s2580_s13 = inlined_call_operand.vmem [shape: f32[1,128], index: 13, kind: input, shape index: {}]   ;;  %s2581_s14 = inlined_call_operand.hbm [shape: f32[16,128], index: 14, kind: output, shape index: {}]  }
   0x1   :  { %20 = vsyncpa [#allocation6], 0 }
   0x2   :  { %21 = vsyncpa [#allocation9], 0 }
   0x3   :  { %22 = vsyncpa [#allocation12], 0 }
   0x4   :  { %23 = vsyncpa [#allocation4], 0  ;;  %s2073_s29 = smov [#allocation5]   ;;  %s2074_s15 = smov [#allocation8]  }
   0x5   :  { %s51_s30 = sshll.u32 %s2073_s29, 4  ;;  %s79_s16 = sshll.u32 %s2074_s15, 4  ;;  %s52_s30 = int_to_ptr.vmem [resolvable:$true] %s51_s30  ;;  %s2162_s16 = int_to_ptr.vmem [resolvable:$true] %s79_s16 }
   0x6   :  { %s1909_s19 = scalar_lea.hbm %s2573_s6, 128 }
   0x7   :  { %p1910_p0 = scmp.ne.s32.totalorder %s2573_s6, %s1909_s19  ;;  %p1913_p1 = scmp.lt.u32.totalorder %s1909_s19, %s2573_s6 }
   0x9   :  { %p1915_p2 = pnand %p1913_p1, %p1910_p0 }
   0xb   :  { %1918 = shalt.err (!%p1915_p2)
}
   0xc   :  { %s1919_s24 = scalar_lea.vmem %s52_s30, 128  ;;  %p1924_p4 = scmp.lt.s32.totalorder %s52_s30, %s52_s30 }
   0xd   :  { %p1920_p3 = scmp.ne.s32.totalorder %s52_s30, %s1919_s24  ;;  %p1925_p5 = scmp.lt.s32.totalorder %s1919_s24, %s1919_s24 }
   0xf   :  { %p1926_p6 = por %p1925_p5, %p1924_p4 }
  0x11   :  { %p1927_p7 = pnand %p1926_p6, %p1920_p3 }
  0x13   :  { %1930 = shalt.err (!%p1927_p7)
}
  0x14   :  { %s2075_s25 = smov 64   ;;  %s2076_s26 = smov 4  }
  0x15   :  { %57 = dma.hbm_to_vmem [thread:$0]  %s2573_s6, 128, %s52_s30, [#allocation6], %s2075_s25, %s2075_s25, %s2076_s26  }
  0x16   :  { %s1931_s17 = scalar_lea.hbm %s2577_s10, 1024 }
  0x17   :  { %p1932_p8 = scmp.ne.s32.totalorder %s2577_s10, %s1931_s17  ;;  %p1935_p9 = scmp.lt.u32.totalorder %s1931_s17, %s2577_s10 }
  0x19   :  { %p1937_p10 = pnand %p1935_p9, %p1932_p8 }
  0x1b   :  { %1940 = shalt.err (!%p1937_p10)
}
  0x1c   :  { %s1941_s22 = scalar_lea.vmem %s2162_s16, 1024  ;;  %p1946_p12 = scmp.lt.s32.totalorder %s2162_s16, %s2162_s16 }
  0x1d   :  { %p1942_p11 = scmp.ne.s32.totalorder %s2162_s16, %s1941_s22  ;;  %p1947_p13 = scmp.lt.s32.totalorder %s1941_s22, %s1941_s22 }
  0x1f   :  { %p1948_p0 = por %p1947_p13, %p1946_p12 }
  0x21   :  { %p1949_p1 = pnand %p1948_p0, %p1942_p11 }
  0x23   :  { %1952 = shalt.err (!%p1949_p1)
}
  0x24   :  { %85 = dma.hbm_to_vmem [thread:$0]  %s2577_s10, 1024, %s2162_s16, [#allocation9], %s2075_s25, %s2075_s25, %s2076_s26  }
  0x25   :  { %s2077_s23 = smov [#allocation2]   ;;  %s2078_s27 = smov [#allocation7]  }
  0x26   :  { %s39_s24 = sshll.u32 %s2077_s23, 4  ;;  %s63_s28 = sshll.u32 %s2078_s27, 4  ;;  %s40_s24 = int_to_ptr.vmem [resolvable:$true] %s39_s24  ;;  %s2199_s28 = int_to_ptr.vmem [resolvable:$true] %s63_s28 }
  0x27   :  { %s1953_s17 = scalar_lea.hbm %s2572_s5, 128 }
  0x28   :  { %p1954_p2 = scmp.ne.s32.totalorder %s2572_s5, %s1953_s17  ;;  %p1957_p3 = scmp.lt.u32.totalorder %s1953_s17, %s2572_s5 }
  0x2a   :  { %p1959_p4 = pnand %p1957_p3, %p1954_p2 }
  0x2c   :  { %1962 = shalt.err (!%p1959_p4)
}
  0x2d   :  { %s1963_s10 = scalar_lea.vmem %s40_s24, 128  ;;  %p1968_p6 = scmp.lt.s32.totalorder %s40_s24, %s40_s24 }
  0x2e   :  { %p1964_p5 = scmp.ne.s32.totalorder %s40_s24, %s1963_s10  ;;  %p1969_p7 = scmp.lt.s32.totalorder %s1963_s10, %s1963_s10 }
  0x30   :  { %p1970_p8 = por %p1969_p7, %p1968_p6 }
  0x32   :  { %p1971_p9 = pnand %p1970_p8, %p1964_p5 }
  0x34   :  { %1974 = shalt.err (!%p1971_p9)
}
  0x35   :  { %45 = dma.hbm_to_vmem [thread:$0]  %s2572_s5, 128, %s40_s24, [#allocation3], %s2075_s25, %s2075_s25, %s2076_s26  }
  0x36   :  { %s1975_s23 = scalar_lea.hbm %s2574_s7, 128 }
  0x37   :  { %p1976_p10 = scmp.ne.s32.totalorder %s2574_s7, %s1975_s23  ;;  %p1979_p11 = scmp.lt.u32.totalorder %s1975_s23, %s2574_s7 }
  0x39   :  { %p1981_p12 = pnand %p1979_p11, %p1976_p10 }
  0x3b   :  { %1984 = shalt.err (!%p1981_p12)
}
  0x3c   :  { %s1985_s18 = scalar_lea.vmem %s2199_s28, 128  ;;  %p1990_p0 = scmp.lt.s32.totalorder %s2199_s28, %s2199_s28 }
  0x3d   :  { %p1986_p13 = scmp.ne.s32.totalorder %s2199_s28, %s1985_s18  ;;  %p1991_p1 = scmp.lt.s32.totalorder %s1985_s18, %s1985_s18 }
  0x3f   :  { %p1992_p2 = por %p1991_p1, %p1990_p0 }
  0x41   :  { %p1993_p3 = pnand %p1992_p2, %p1986_p13 }
  0x43   :  { %1996 = shalt.err (!%p1993_p3)
}
  0x44   :  { %69 = dma.hbm_to_vmem [thread:$0]  %s2574_s7, 128, %s2199_s28, [#allocation6], %s2075_s25, %s2075_s25, %s2076_s26  }
  0x45   :  { %s2079_s19 = smov [#allocation10]   ;;  %s2080_s21 = smov [#allocation11]  }
  0x46   :  { %s91_s20 = sshll.u32 %s2079_s19, 4  ;;  %s103_s10 = sshll.u32 %s2080_s21, 4  ;;  %s92_s20 = int_to_ptr.vmem [resolvable:$true] %s91_s20  ;;  %s2236_s10 = int_to_ptr.vmem [resolvable:$true] %s103_s10 }
  0x47   :  { %s1997_s6 = scalar_lea.hbm %s2578_s11, 1024 }
  0x48   :  { %p1998_p4 = scmp.ne.s32.totalorder %s2578_s11, %s1997_s6  ;;  %p2001_p5 = scmp.lt.u32.totalorder %s1997_s6, %s2578_s11 }
  0x4a   :  { %p2003_p6 = pnand %p2001_p5, %p1998_p4 }
  0x4c   :  { %2006 = shalt.err (!%p2003_p6)
}
  0x4d   :  { %s2007_s7 = scalar_lea.vmem %s92_s20, 1024  ;;  %p2012_p8 = scmp.lt.s32.totalorder %s92_s20, %s92_s20 }
  0x4e   :  { %p2008_p7 = scmp.ne.s32.totalorder %s92_s20, %s2007_s7  ;;  %p2013_p9 = scmp.lt.s32.totalorder %s2007_s7, %s2007_s7 }
  0x50   :  { %p2014_p10 = por %p2013_p9, %p2012_p8 }
  0x52   :  { %p2015_p11 = pnand %p2014_p10, %p2008_p7 }
  0x54   :  { %2018 = shalt.err (!%p2015_p11)
}
  0x55   :  { %97 = dma.hbm_to_vmem [thread:$0]  %s2578_s11, 1024, %s92_s20, [#allocation9], %s2075_s25, %s2075_s25, %s2076_s26  }
  0x56   :  { %s2019_s5 = scalar_lea.hbm %s2579_s12, 1024 }
  0x57   :  { %p2020_p12 = scmp.ne.s32.totalorder %s2579_s12, %s2019_s5  ;;  %p2023_p13 = scmp.lt.u32.totalorder %s2019_s5, %s2579_s12 }
  0x59   :  { %p2025_p0 = pnand %p2023_p13, %p2020_p12 }
  0x5b   :  { %2028 = shalt.err (!%p2025_p0)
}
  0x5c   :  { %s2029_s22 = scalar_lea.vmem %s2236_s10, 1024  ;;  %p2034_p2 = scmp.lt.s32.totalorder %s2236_s10, %s2236_s10 }
  0x5d   :  { %p2030_p1 = scmp.ne.s32.totalorder %s2236_s10, %s2029_s22  ;;  %p2035_p3 = scmp.lt.s32.totalorder %s2029_s22, %s2029_s22 }
  0x5f   :  { %p2036_p4 = por %p2035_p3, %p2034_p2 }
  0x61   :  { %p2037_p5 = pnand %p2036_p4, %p2030_p1 }
  0x63   :  { %2040 = shalt.err (!%p2037_p5)
}
  0x64   :  { %109 = dma.hbm_to_vmem [thread:$0]  %s2579_s12, 1024, %s2236_s10, [#allocation12], %s2075_s25, %s2075_s25, %s2076_s26  }
  0x65   :  { %2063 = dma.done.wait [#allocation3], 128  }
  0x66   :  { %2064 = vsyncadd [#allocation3], 4294967168 }
  0x67   :  { %2065 = dma.done.wait [#allocation6], 256  }
  0x68   :  { %2066 = vsyncadd [#allocation6], 4294967040 }
  0x69   :  { %2067 = dma.done.wait [#allocation9], 2048  }
  0x6a   :  { %2068 = vsyncadd [#allocation9], 4294965248 }
  0x6b   :  { %2069 = dma.done.wait [#allocation12], 1024  }
  0x6c   :  { %2070 = vsyncadd [#allocation12], 4294966272  ;;  %v2081_v0 = vmov 0.0   ;;  %vm2082_vm0 = vmmov 0   ;;  %v1866_v1 = vld [vmem:[%s2576_s9] sm:$0xff]   ;;  %v1867_v2 = vld [vmem:[%s2576_s9 + $0x8] sm:$0xff]  }
  0x6d   :  { %1599 = vmatprep.subr.bf16.mxu0 %v2081_v0  ;;  %1615 = vmatprep.mubr.msk.bf16.mxu0 %vm2082_vm0, %v2081_v0  ;;  %v1868_v3 = vld [vmem:[%s2576_s9 + $0x10] sm:$0xff]   ;;  %v1869_v4 = vld [vmem:[%s2576_s9 + $0x18] sm:$0xff]   ;;  %v1870_v5 = vld [vmem:[%s2576_s9 + $0x20] sm:$0xff]   ;;  %vm337_vm1 = vcmask 130048   ;;  %vm465_vm2 = vcmask 261120  }
  0x6e   :  { %1600 = vmatpush3.bf16.msra.mxu0 %v1866_v1  ;;  %v1871_v6 = vld [vmem:[%s2576_s9 + $0x28] sm:$0xff]   ;;  %v1872_v7 = vld [vmem:[%s2576_s9 + $0x30] sm:$0xff]   ;;  %v1873_v8 = vld [vmem:[%s2576_s9 + $0x38] sm:$0xff]  }
  0x6f   :  { %1601 = vmatprep.subr.bf16.mxu0 %v2081_v0  ;;  %v1874_v9 = vld [vmem:[%s2567_s0] sm:$0xff]   ;;  %v2348_v26 = vld [vmem:[%s2571_s4 + $0x8] sm:$0xff]   ;;  %v2369_v29 = vld [vmem:[#allocation8] sm:$0xff]  }
  0x70   :  { %v1875_v10 = vld [vmem:[%s2568_s1] sm:$0xff]   ;;  %v2363_v28 = vld [vmem:[%s2570_s3 + $0x8] sm:$0xff]   ;;  %v2380_v32 = vld [vmem:[#allocation8 + $0x18] sm:$0xff]  }
  0x71   :  { %v2329_v11 = vld [vmem:[%s2571_s4] sm:$0xff]   ;;  %v2376_v31 = vld [vmem:[#allocation8 + $0x10] sm:$0xff]   ;;  %v2384_v33 = vld [vmem:[#allocation8 + $0x20] sm:$0xff]  }
  0x72   :  { %1602 = vmatpush3.bf16.msra.mxu0 %v1867_v2  ;;  %1641 = vmatprep.mubr.msk.bf16.mxu1 %vm337_vm1, %v2329_v11  ;;  %v2353_v27 = vld [vmem:[%s2570_s3] sm:$0xff]   ;;  %v2402_v42 = vld [vmem:[#allocation5] sm:$0xff]   ;;  %v2427_v44 = vld [vmem:[#allocation8 + $0x38] sm:$0xff]  }
  0x73   :  { %1603 = vmatprep.subr.bf16.mxu0 %v2081_v0  ;;  %v2372_v30 = vld [vmem:[#allocation8 + $0x8] sm:$0xff]   ;;  %v2421_v43 = vld [vmem:[#allocation8 + $0x30] sm:$0xff]  }
  0x74   :  { %v2388_v34 = vld [vmem:[#allocation8 + $0x28] sm:$0xff]  }
  0x75   :  { %v2394_v41 = vld [vmem:[#allocation2] sm:$0xff]  }
  0x76   :  { %1604 = vmatpush3.bf16.msra.mxu0 %v1868_v3 }
  0x77   :  { %1605 = vmatprep.subr.bf16.mxu0 %v2081_v0 }
  0x7a   :  { %1606 = vmatpush3.bf16.msra.mxu0 %v1869_v4 }
  0x7b   :  { %1607 = vmatprep.subr.bf16.mxu0 %v2081_v0 }
  0x7e   :  { %1608 = vmatpush3.bf16.msra.mxu0 %v1870_v5 }
  0x7f   :  { %1609 = vmatprep.subr.bf16.mxu0 %v2081_v0 }
  0x82   :  { %1610 = vmatpush3.bf16.msra.mxu0 %v1871_v6 }
  0x83   :  { %1611 = vmatprep.subr.bf16.mxu0 %v2081_v0 }
  0x86   :  { %1612 = vmatpush3.bf16.msra.mxu0 %v1872_v7 }
  0x87   :  { %1613 = vmatprep.subr.bf16.mxu0 %v2081_v0 }
  0x8a   :  { %1614 = vmatpush3.bf16.msra.mxu0 %v1873_v8 }
  0x8b   :  { %1619 = vmatprep.subr.bf16.mxu0 %v2081_v0 }
  0x8d   :  { %1616 = vmatmul.mubr.bf16.vlgmr.msra.gmra.mrb[0].mxu0 %v1874_v9 }
  0x8e   :  { %1620 = vmatpush3.bf16.msra.mxu0 %v1866_v1  ;;  %1635 = vmatprep.mubr.msk.bf16.mxu0 %vm2082_vm0, %v2081_v0 }
  0x8f   :  { %1621 = vmatprep.subr.bf16.mxu0 %v2081_v0 }
  0x92   :  { %1622 = vmatpush3.bf16.msra.mxu0 %v1867_v2 }
  0x93   :  { %1623 = vmatprep.subr.bf16.mxu0 %v2081_v0 }
  0x96   :  { %1624 = vmatpush3.bf16.msra.mxu0 %v1868_v3 }
  0x97   :  { %1625 = vmatprep.subr.bf16.mxu0 %v2081_v0 }
  0x9a   :  { %1626 = vmatpush3.bf16.msra.mxu0 %v1869_v4 }
  0x9b   :  { %1627 = vmatprep.subr.bf16.mxu0 %v2081_v0 }
  0x9e   :  { %1628 = vmatpush3.bf16.msra.mxu0 %v1870_v5 }
  0x9f   :  { %1629 = vmatprep.subr.bf16.mxu0 %v2081_v0 }
  0xa2   :  { %1630 = vmatpush3.bf16.msra.mxu0 %v1871_v6 }
  0xa3   :  { %1631 = vmatprep.subr.bf16.mxu0 %v2081_v0 }
  0xa6   :  { %1632 = vmatpush3.bf16.msra.mxu0 %v1872_v7 }
  0xa7   :  { %1633 = vmatprep.subr.bf16.mxu0 %v2081_v0 }
  0xaa   :  { %1634 = vmatpush3.bf16.msra.mxu0 %v1873_v8 }
  0xab   :  { %1667 = vmatprep.subr.bf16.mxu0 %v2081_v0 }
  0xad   :  { %1636 = vmatmul.mubr.bf16.vlgmr.msra.gmra.mrb[4].mxu0 %v1875_v10 }
  0xae   :  { %1683 = vmatprep.mubr.msk.bf16.mxu0 %vm2082_vm0, %v2081_v0  ;;  %1668 = vmatpush3.bf16.msra.mxu0 %v2369_v29 }
  0xaf   :  { %1669 = vmatprep.subr.bf16.mxu0 %v2081_v0 }
  0xb2   :  { %1670 = vmatpush3.bf16.msra.mxu0 %v2372_v30 }
  0xb3   :  { %1671 = vmatprep.subr.bf16.mxu0 %v2081_v0 }
  0xb6   :  { %1672 = vmatpush3.bf16.msra.mxu0 %v2376_v31 }
  0xb7   :  { %1673 = vmatprep.subr.bf16.mxu0 %v2081_v0 }
  0xba   :  { %1674 = vmatpush3.bf16.msra.mxu0 %v2380_v32 }
  0xbb   :  { %1675 = vmatprep.subr.bf16.mxu0 %v2081_v0 }
  0xbe   :  { %1676 = vmatpush3.bf16.msra.mxu0 %v2384_v33 }
  0xbf   :  { %1677 = vmatprep.subr.bf16.mxu0 %v2081_v0 }
  0xc2   :  { %1678 = vmatpush3.bf16.msra.mxu0 %v2388_v34 }
  0xc3   :  { %1679 = vmatprep.subr.bf16.mxu0 %v2081_v0 }
  0xc6   :  { %1680 = vmatpush3.bf16.msra.mxu0 %v2421_v43 }
  0xc7   :  { %1681 = vmatprep.subr.bf16.mxu0 %v2081_v0 }
  0xca   :  { %1682 = vmatpush3.bf16.msra.mxu0 %v2427_v44 }
 0x160   :  { %v265_v12 = vpop.f32.mrb[0].mxu0 }
 0x161   :  { %v1617_v13 = vpop.f32.mrb[1].mxu0  ;;  %v2333_v19 = vmax.f32 %v265_v12, 0.0 }
 0x162   :  { %v268_v14 = vpop.f32.mrb[2].mxu0 }
 0x163   :  { %v1618_v15 = vpop.f32.mrb[3].mxu0  ;;  %v2335_v20 = vmax.f32 %v268_v14, 0.0 }
 0x165   :  { %v325_v25 = vpack.c.bf16 %v2335_v20, %v2333_v19 }
 0x180   :  { %v316_v16 = vpop.f32.mrb[4].mxu0 }
 0x181   :  { %v1637_v17 = vpop.f32.mrb[5].mxu0  ;;  %v2337_v21 = vmax.f32 %v316_v16, 0.0 }
 0x182   :  { %v319_v18 = vpop.f32.mrb[6].mxu0 }
 0x183   :  { %v2339_v22 = vmax.f32 %v319_v18, 0.0  ;;  %v1638_v23 = vpop.f32.mrb[7].mxu0 }
 0x185   :  { %v326_v24 = vpack.c.bf16 %v2339_v22, %v2337_v21 }
 0x187   :  { %1639 = vmatprep.subr.bf16.mxu1 %v326_v24 }
 0x188   :  { %1640 = vmatpush3.bf16.msra.mxu1 %v326_v24 }
 0x189   :  { %1645 = vmatprep.subr.bf16.mxu1 %v325_v25 }
 0x18b   :  { %1642 = vmatmul.mubr.msk.bf16.vlgmr.msra.gmra.mrb[0].mxu1 %vm337_vm1, %v2348_v26 }
 0x18c   :  { %1646 = vmatpush3.bf16.msra.mxu1 %v325_v25  ;;  %1647 = vmatprep.mubr.msk.bf16.mxu1 %vm337_vm1, %v2353_v27 }
 0x18d   :  { %1651 = vmatprep.subr.bf16.mxu1 %v2081_v0 }
 0x197   :  { %1648 = vmatmul.mubr.msk.bf16.vlgmr.msra.gmra.mrb[0].mxu1 %vm337_vm1, %v2363_v28 }
 0x198   :  { %1655 = vmatprep.mubr.msk.bf16.mxu1 %vm2082_vm0, %v2081_v0 }
 0x26a   :  { %v1649_v35 = vpop.f32.mrb[0].mxu1 }
 0x26b   :  { %v443_v36 = vpop.f32.mrb[1].mxu1 }
 0x26c   :  { %v1650_v37 = vpop.f32.mrb[2].mxu1 }
 0x26d   :  { %v459_v38 = vpack.c.bf16 %v1650_v37, %v1649_v35  ;;  %v446_v39 = vpop.f32.mrb[3].mxu1 }
 0x26e   :  { %v458_v40 = vpack.c.bf16 %v446_v39, %v443_v36 }
 0x270   :  { %1652 = vmatpush3.bf16.msra.mxu1 %v458_v40 }
 0x271   :  { %1653 = vmatprep.subr.bf16.mxu1 %v2081_v0 }
 0x274   :  { %1654 = vmatpush3.bf16.msra.mxu1 %v459_v38 }
 0x275   :  { %1659 = vmatprep.subr.bf16.mxu1 %v2081_v0 }
 0x277   :  { %1656 = vmatmul.mubr.msk.bf16.vlgmr.msra.gmra.mrb[4].mxu1 %vm465_vm2, %v2394_v41 }
 0x278   :  { %1660 = vmatpush3.bf16.msra.mxu1 %v458_v40  ;;  %1663 = vmatprep.mubr.msk.bf16.mxu1 %vm2082_vm0, %v2081_v0 }
 0x279   :  { %1661 = vmatprep.subr.bf16.mxu1 %v2081_v0 }
 0x27c   :  { %1662 = vmatpush3.bf16.msra.mxu1 %v459_v38 }
 0x27d   :  { %1687 = vmatprep.subr.bf16.mxu1 %v2081_v0 }
 0x27f   :  { %1664 = vmatmul.mubr.msk.bf16.vlgmr.msra.gmra.mrb[8].mxu1 %vm465_vm2, %v2402_v42 }
 0x280   :  { %1688 = vmatpush3.bf16.msra.mxu1 %v2369_v29  ;;  %1703 = vmatprep.mubr.msk.bf16.mxu1 %vm2082_vm0, %v2081_v0 }
 0x281   :  { %1689 = vmatprep.subr.bf16.mxu1 %v2081_v0 }
 0x284   :  { %1690 = vmatpush3.bf16.msra.mxu1 %v2372_v30 }
 0x285   :  { %1691 = vmatprep.subr.bf16.mxu1 %v2081_v0 }
 0x288   :  { %1692 = vmatpush3.bf16.msra.mxu1 %v2376_v31 }
 0x289   :  { %1693 = vmatprep.subr.bf16.mxu1 %v2081_v0 }
 0x28c   :  { %1694 = vmatpush3.bf16.msra.mxu1 %v2380_v32 }
 0x28d   :  { %1695 = vmatprep.subr.bf16.mxu1 %v2081_v0 }
 0x290   :  { %1696 = vmatpush3.bf16.msra.mxu1 %v2384_v33 }
 0x291   :  { %1697 = vmatprep.subr.bf16.mxu1 %v2081_v0 }
 0x294   :  { %1698 = vmatpush3.bf16.msra.mxu1 %v2388_v34 }
 0x295   :  { %1699 = vmatprep.subr.bf16.mxu1 %v2081_v0 }
 0x298   :  { %1700 = vmatpush3.bf16.msra.mxu1 %v2421_v43 }
 0x299   :  { %1701 = vmatprep.subr.bf16.mxu1 %v2081_v0 }
 0x29c   :  { %1702 = vmatpush3.bf16.msra.mxu1 %v2427_v44 }
 0x29d   :  { %1719 = vmatprep.subr.bf16.mxu1 %v2081_v0 }
 0x34a   :  { %v503_v45 = vpop.f32.mrb[4].mxu1 }
 0x34b   :  { %v1657_v46 = vpop.f32.mrb[5].mxu1  ;;  %v510_v48 = vsub.f32 %v503_v45, %v2337_v21  ;;  %v1894_v45 = vld [vmem:[#allocation11 + $0x20] sm:$0xff]  }
 0x34c   :  { %v506_v47 = vpop.f32.mrb[6].mxu1  ;;  %v1895_v46 = vld [vmem:[#allocation11 + $0x28] sm:$0xff]  }
 0x34d   :  { %v511_v49 = vsub.f32 %v506_v47, %v2339_v22  ;;  %v1658_v50 = vpop.f32.mrb[7].mxu1  ;;  %v1896_v47 = vld [vmem:[#allocation11 + $0x30] sm:$0xff]  }
 0x34f   :  { %v563_v51 = vpack.c.bf16 %v511_v49, %v510_v48 }
 0x351   :  { %1684 = vmatmul.mubr.bf16.vlgmr.msra.gmra.mrb[8].mxu0 %v563_v51 }
 0x352   :  { %v554_v52 = vpop.f32.mrb[8].mxu1  ;;  %1709 = vmatprep.mubr.msk.bf16.mxu0 %vm337_vm1, %v2329_v11 }
 0x353   :  { %v1665_v53 = vpop.f32.mrb[9].mxu1  ;;  %v561_v55 = vsub.f32 %v554_v52, %v2333_v19 }
 0x354   :  { %v557_v54 = vpop.f32.mrb[10].mxu1 }
 0x355   :  { %v562_v56 = vsub.f32 %v557_v54, %v2335_v20  ;;  %v1666_v57 = vpop.f32.mrb[11].mxu1 }
 0x357   :  { %v657_v58 = vpack.c.bf16 %v562_v56, %v561_v55 }
 0x359   :  { %1704 = vmatmul.mubr.bf16.vlgmr.msra.gmra.mrb[12].mxu1 %v657_v58 }
 0x35a   :  { %1723 = vmatprep.mubr.msk.bf16.mxu1 %vm2082_vm0, %v2081_v0 }
 0x424   :  { %v646_v59 = vpop.f32.mrb[8].mxu0 }
 0x425   :  { %v1685_v60 = vpop.f32.mrb[9].mxu0  ;;  %v2447_v5 = vadd.f32 %v646_v59, %v2333_v19 }
 0x426   :  { %v649_v61 = vpop.f32.mrb[10].mxu0 }
 0x427   :  { %v1686_v62 = vpop.f32.mrb[11].mxu0  ;;  %v2441_v1 = vadd.f32 %v649_v61, %v2335_v20  ;;  %v655_v12 = vmax.f32 %v2447_v5, 0.0 }
 0x429   :  { %v656_v8 = vmax.f32 %v2441_v1, 0.0 }
 0x42b   :  { %v703_v14 = vpack.c.bf16 %v656_v8, %v655_v12 }
 0x42c   :  { %v692_v63 = vpop.f32.mrb[12].mxu1 }
 0x42d   :  { %v2444_v2 = vadd.f32 %v692_v63, %v2337_v21  ;;  %v1705_v3 = vpop.f32.mrb[13].mxu1 }
 0x42e   :  { %v695_v4 = vpop.f32.mrb[14].mxu1 }
 0x42f   :  { %v2450_v6 = vadd.f32 %v695_v4, %v2339_v22  ;;  %v1706_v7 = vpop.f32.mrb[15].mxu1  ;;  %v701_v9 = vmax.f32 %v2444_v2, 0.0 }
 0x430   :  { %v1901_v7 = vld [vmem:[#allocation10 + $0x18] sm:$0xff]  }
 0x431   :  { %v702_v10 = vmax.f32 %v2450_v6, 0.0  ;;  %v1899_v6 = vld [vmem:[#allocation10 + $0x8] sm:$0xff]  }
 0x433   :  { %v704_v13 = vpack.c.bf16 %v702_v10, %v701_v9 }
 0x435   :  { %1707 = vmatprep.subr.bf16.mxu0 %v704_v13 }
 0x436   :  { %1708 = vmatpush3.bf16.msra.mxu0 %v704_v13  ;;  %v1907_v13 = vld [vmem:[%s2569_s2 + $0x8] sm:$0xff]  }
 0x437   :  { %1713 = vmatprep.subr.bf16.mxu0 %v703_v14 }
 0x439   :  { %1710 = vmatmul.mubr.msk.bf16.vlgmr.msra.gmra.mrb[12].mxu0 %vm337_vm1, %v2348_v26 }
 0x43a   :  { %1714 = vmatpush3.bf16.msra.mxu0 %v703_v14  ;;  %1715 = vmatprep.mubr.msk.bf16.mxu0 %vm337_vm1, %v2353_v27  ;;  %v1395_v14 = vld [vmem:[%s2575_s8] sm:$0xff] }
 0x43b   :  { %1735 = vmatprep.subr.bf16.mxu0 %v2081_v0 }
 0x445   :  { %1716 = vmatmul.mubr.msk.bf16.vlgmr.msra.gmra.mrb[12].mxu0 %vm337_vm1, %v2363_v28 }
 0x446   :  { %1736 = vmatpush3.bf16.msra.mxu0 %v2369_v29  ;;  %1751 = vmatprep.mubr.msk.bf16.mxu0 %vm2082_vm0, %v2081_v0 }
 0x447   :  { %1737 = vmatprep.subr.bf16.mxu0 %v2081_v0 }
 0x44a   :  { %1738 = vmatpush3.bf16.msra.mxu0 %v2372_v30 }
 0x44b   :  { %1739 = vmatprep.subr.bf16.mxu0 %v2081_v0 }
 0x44e   :  { %1740 = vmatpush3.bf16.msra.mxu0 %v2376_v31 }
 0x44f   :  { %1741 = vmatprep.subr.bf16.mxu0 %v2081_v0 }
 0x452   :  { %1742 = vmatpush3.bf16.msra.mxu0 %v2380_v32 }
 0x453   :  { %1743 = vmatprep.subr.bf16.mxu0 %v2081_v0 }
 0x456   :  { %1744 = vmatpush3.bf16.msra.mxu0 %v2384_v33 }
 0x457   :  { %1745 = vmatprep.subr.bf16.mxu0 %v2081_v0 }
 0x45a   :  { %1746 = vmatpush3.bf16.msra.mxu0 %v2388_v34 }
 0x45b   :  { %1747 = vmatprep.subr.bf16.mxu0 %v2081_v0 }
 0x45e   :  { %1748 = vmatpush3.bf16.msra.mxu0 %v2421_v43 }
 0x45f   :  { %1749 = vmatprep.subr.bf16.mxu0 %v2081_v0 }
 0x462   :  { %1750 = vmatpush3.bf16.msra.mxu0 %v2427_v44 }
 0x518   :  { %v1717_v15 = vpop.f32.mrb[12].mxu0 }
 0x519   :  { %v788_v16 = vpop.f32.mrb[13].mxu0 }
 0x51a   :  { %v1718_v17 = vpop.f32.mrb[14].mxu0 }
 0x51b   :  { %v804_v18 = vpack.c.bf16 %v1718_v17, %v1717_v15  ;;  %v791_v23 = vpop.f32.mrb[15].mxu0  ;;  %v2083_v15 = vmov 0   ;;  %v1489_v17 = vld [vmem:[%s2580_s13] ss:$0 sm:$0xff] }
 0x51c   :  { %v803_v24 = vpack.c.bf16 %v791_v23, %v788_v16  ;;  %1865 = vset.pattern.permute.xlu0 %v2083_v15  ;;  %v1396_v16 = vld [vmem:[%s2575_s8 + $0x8] sm:$0xff] }
 0x51d   :  { %1399 = vperm.xlu0 %1865, %v1395_v14  }
 0x51e   :  { %1720 = vmatpush3.bf16.msra.mxu1 %v803_v24 }
 0x51f   :  { %1721 = vmatprep.subr.bf16.mxu1 %v2081_v0 }
 0x521   :  { %1404 = vperm.xlu0 %1865, %v1396_v16  }
 0x522   :  { %1722 = vmatpush3.bf16.msra.mxu1 %v804_v18 }
 0x523   :  { %1727 = vmatprep.subr.bf16.mxu1 %v2081_v0 }
 0x525   :  { %1724 = vmatmul.mubr.msk.bf16.vlgmr.msra.gmra.mrb[16].mxu1 %vm465_vm2, %v2394_v41 }
 0x526   :  { %1728 = vmatpush3.bf16.msra.mxu1 %v803_v24  ;;  %1731 = vmatprep.mubr.msk.bf16.mxu1 %vm2082_vm0, %v2081_v0 }
 0x527   :  { %1729 = vmatprep.subr.bf16.mxu1 %v2081_v0 }
 0x52a   :  { %1730 = vmatpush3.bf16.msra.mxu1 %v804_v18 }
 0x52b   :  { %1755 = vmatprep.subr.bf16.mxu1 %v2081_v0 }
 0x52d   :  { %1732 = vmatmul.mubr.msk.bf16.vlgmr.msra.gmra.mrb[20].mxu1 %vm465_vm2, %v2402_v42  ;;  %v1890_v42 = vld [vmem:[#allocation11] sm:$0xff]  }
 0x52e   :  { %1756 = vmatpush3.bf16.msra.mxu1 %v2369_v29  ;;  %1771 = vmatprep.mubr.msk.bf16.mxu1 %vm2082_vm0, %v2081_v0 }
 0x52f   :  { %1757 = vmatprep.subr.bf16.mxu1 %v2081_v0 }
 0x532   :  { %1758 = vmatpush3.bf16.msra.mxu1 %v2372_v30 }
 0x533   :  { %1759 = vmatprep.subr.bf16.mxu1 %v2081_v0 }
 0x536   :  { %1760 = vmatpush3.bf16.msra.mxu1 %v2376_v31 }
 0x537   :  { %1761 = vmatprep.subr.bf16.mxu1 %v2081_v0 }
 0x53a   :  { %1762 = vmatpush3.bf16.msra.mxu1 %v2380_v32 }
 0x53b   :  { %1763 = vmatprep.subr.bf16.mxu1 %v2081_v0 }
 0x53e   :  { %1764 = vmatpush3.bf16.msra.mxu1 %v2384_v33 }
 0x53f   :  { %1765 = vmatprep.subr.bf16.mxu1 %v2081_v0 }
 0x542   :  { %1766 = vmatpush3.bf16.msra.mxu1 %v2388_v34 }
 0x543   :  { %1767 = vmatprep.subr.bf16.mxu1 %v2081_v0 }
 0x546   :  { %1768 = vmatpush3.bf16.msra.mxu1 %v2421_v43  ;;  %v1891_v43 = vld [vmem:[#allocation11 + $0x8] sm:$0xff]  }
 0x547   :  { %1769 = vmatprep.subr.bf16.mxu1 %v2081_v0 }
 0x54a   :  { %1770 = vmatpush3.bf16.msra.mxu1 %v2427_v44  ;;  %v1892_v44 = vld [vmem:[#allocation11 + $0x10] sm:$0xff]  }
 0x54b   :  { %1787 = vmatprep.subr.bf16.mxu1 %v1890_v42 }
 0x5f8   :  { %v839_v25 = vpop.f32.mrb[16].mxu1 }
 0x5f9   :  { %v1725_v29 = vpop.f32.mrb[17].mxu1  ;;  %v846_v31 = vsub.f32 %v839_v25, %v701_v9  ;;  %v1903_v9 = vld [vmem:[#allocation10 + $0x28] sm:$0xff]  }
 0x5fa   :  { %v842_v30 = vpop.f32.mrb[18].mxu1 }
 0x5fb   :  { %v847_v32 = vsub.f32 %v842_v30, %v702_v10  ;;  %v1726_v33 = vpop.f32.mrb[19].mxu1  ;;  %v1904_v10 = vld [vmem:[#allocation10 + $0x30] sm:$0xff]  }
 0x5fd   :  { %v891_v35 = vpack.c.bf16 %v847_v32, %v846_v31 }
 0x5ff   :  { %1752 = vmatmul.mubr.bf16.vlgmr.msra.gmra.mrb[16].mxu0 %v891_v35 }
 0x600   :  { %v882_v34 = vpop.f32.mrb[20].mxu1  ;;  %1777 = vmatprep.mubr.msk.bf16.mxu0 %vm337_vm1, %v2329_v11  ;;  %v1893_v11 = vld [vmem:[#allocation11 + $0x18] sm:$0xff]  }
 0x601   :  { %v1733_v36 = vpop.f32.mrb[21].mxu1  ;;  %v889_v38 = vsub.f32 %v882_v34, %v655_v12  ;;  %v1905_v12 = vld [vmem:[#allocation10 + $0x38] sm:$0xff]  }
 0x602   :  { %v885_v37 = vpop.f32.mrb[22].mxu1 }
 0x603   :  { %v890_v39 = vsub.f32 %v885_v37, %v656_v8  ;;  %v1734_v40 = vpop.f32.mrb[23].mxu1  ;;  %v1902_v8 = vld [vmem:[#allocation10 + $0x20] sm:$0xff]  }
 0x604   :  { %v1400_v40 = vpop.permute.xlu0 %1399 }
 0x605   :  { %v937_v41 = vpack.c.bf16 %v890_v39, %v889_v38  ;;  %v1908_v39 = vld [vmem:[#allocation7] sm:$0xff]  }
 0x607   :  { %1772 = vmatmul.mubr.bf16.vlgmr.msra.gmra.mrb[24].mxu1 %v937_v41 }
 0x608   :  { %1788 = vmatpush3.bf16.msra.mxu1 %v1890_v42 }
 0x609   :  { %1789 = vmatprep.subr.bf16.mxu1 %v1891_v43 }
 0x60c   :  { %1790 = vmatpush3.bf16.msra.mxu1 %v1891_v43 }
 0x60d   :  { %1791 = vmatprep.subr.bf16.mxu1 %v1892_v44 }
 0x610   :  { %1792 = vmatpush3.bf16.msra.mxu1 %v1892_v44  ;;  %v1405_v44 = vpop.permute.xlu0 %1404 }
 0x611   :  { %1793 = vmatprep.subr.bf16.mxu1 %v1893_v11 }
 0x614   :  { %1794 = vmatpush3.bf16.msra.mxu1 %v1893_v11 }
 0x615   :  { %1795 = vmatprep.subr.bf16.mxu1 %v1894_v45 }
 0x618   :  { %1796 = vmatpush3.bf16.msra.mxu1 %v1894_v45 }
 0x619   :  { %1797 = vmatprep.subr.bf16.mxu1 %v1895_v46 }
 0x61c   :  { %1798 = vmatpush3.bf16.msra.mxu1 %v1895_v46 }
 0x61d   :  { %1799 = vmatprep.subr.bf16.mxu1 %v1896_v47 }
 0x620   :  { %1800 = vmatpush3.bf16.msra.mxu1 %v1896_v47 }
 0x6d2   :  { %v926_v48 = vpop.f32.mrb[16].mxu0 }
 0x6d3   :  { %v933_v49 = vadd.f32 %v926_v48, %v2333_v19  ;;  %v1753_v50 = vpop.f32.mrb[17].mxu0  ;;  %v1897_v19 = vld [vmem:[#allocation11 + $0x38] sm:$0xff]  }
 0x6d4   :  { %v929_v51 = vpop.f32.mrb[18].mxu0  ;;  %1801 = vmatprep.subr.bf16.mxu1 %v1897_v19 }
 0x6d5   :  { %v934_v52 = vadd.f32 %v929_v51, %v2335_v20  ;;  %v1754_v53 = vpop.f32.mrb[19].mxu0  ;;  %v935_v54 = vmax.f32 %v933_v49, 0.0  ;;  %1802 = vmatpush3.bf16.msra.mxu1 %v1897_v19  ;;  %v1898_v20 = vld [vmem:[#allocation10] sm:$0xff]  }
 0x6d6   :  { %1807 = vmatprep.subr.bf16.mxu1 %v1898_v20 }
 0x6d7   :  { %v936_v55 = vmax.f32 %v934_v52, 0.0 }
 0x6d9   :  { %v983_v56 = vpack.c.bf16 %v936_v55, %v935_v54 }
 0x6da   :  { %v972_v57 = vpop.f32.mrb[24].mxu1 }
 0x6db   :  { %v979_v58 = vadd.f32 %v972_v57, %v2337_v21  ;;  %v1773_v59 = vpop.f32.mrb[25].mxu1 }
 0x6dc   :  { %v975_v60 = vpop.f32.mrb[26].mxu1 }
 0x6dd   :  { %v980_v61 = vadd.f32 %v975_v60, %v2339_v22  ;;  %v1774_v62 = vpop.f32.mrb[27].mxu1  ;;  %v981_v63 = vmax.f32 %v979_v58, 0.0 }
 0x6df   :  { %v982_v1 = vmax.f32 %v980_v61, 0.0 }
 0x6e1   :  { %v984_v2 = vpack.c.bf16 %v982_v1, %v981_v63 }
 0x6e3   :  { %1775 = vmatprep.subr.bf16.mxu0 %v984_v2 }
 0x6e4   :  { %1776 = vmatpush3.bf16.msra.mxu0 %v984_v2 }
 0x6e5   :  { %1781 = vmatprep.subr.bf16.mxu0 %v983_v56 }
 0x6e7   :  { %1778 = vmatmul.mubr.msk.bf16.vlgmr.msra.gmra.mrb[20].mxu0 %vm337_vm1, %v2348_v26 }
 0x6e8   :  { %1782 = vmatpush3.bf16.msra.mxu0 %v983_v56  ;;  %1783 = vmatprep.mubr.msk.bf16.mxu0 %vm337_vm1, %v2353_v27  ;;  %v1906_v27 = vld [vmem:[%s2569_s2] sm:$0xff]   ;;  %s2084_s2 = smov [#allocation13]  }
 0x6e9   :  { %1827 = vmatprep.subr.bf16.mxu0 %v2081_v0  ;;  %s1416_s8 = sshll.u32 %s2084_s2, 4  ;;  %s1417_s8 = int_to_ptr.vmem [resolvable:$true] %s1416_s8 }
 0x6ea   :  { %s2041_s13 = scalar_lea.vmem %s1417_s8, 256  ;;  %p2046_p7 = scmp.lt.s32.totalorder %s1417_s8, %s1417_s8 }
 0x6eb   :  { %p2042_p6 = scmp.ne.s32.totalorder %s1417_s8, %s2041_s13  ;;  %p2047_p8 = scmp.lt.s32.totalorder %s2041_s13, %s2041_s13 }
 0x6ed   :  { %p2048_p9 = por %p2047_p8, %p2046_p7 }
 0x6ef   :  { %p2049_p10 = pnand %p2048_p9, %p2042_p6 }
 0x6f3   :  { %1784 = vmatmul.mubr.msk.bf16.vlgmr.msra.gmra.mrb[20].mxu0 %vm337_vm1, %v2363_v28  ;;  %v1900_v28 = vld [vmem:[#allocation10 + $0x10] sm:$0xff]  }
 0x6f4   :  { %1831 = vmatprep.mubr.msk.bf16.mxu0 %vm2082_vm0, %v2081_v0 }
 0x7c6   :  { %v1785_v21 = vpop.f32.mrb[20].mxu0 }
 0x7c7   :  { %v1068_v22 = vpop.f32.mrb[21].mxu0 }
 0x7c8   :  { %v1786_v26 = vpop.f32.mrb[22].mxu0 }
 0x7c9   :  { %v1104_v3 = vpack.c.bf16 %v1786_v26, %v1785_v21  ;;  %v1071_v4 = vpop.f32.mrb[23].mxu0 }
 0x7ca   :  { %v1103_v5 = vpack.c.bf16 %v1071_v4, %v1068_v22 }
 0x7cc   :  { %1803 = vmatprep.mubr.bf16.mxu1 %v1103_v5 }
 0x7cd   :  { %1804 = vmatmul.mubr.bf16.vlgmr.msra.gmra.mrb[28].mxu1 %v1104_v3 }
 0x7ce   :  { %1808 = vmatpush3.bf16.msra.mxu1 %v1898_v20  ;;  %1823 = vmatprep.mubr.bf16.mxu1 %v1906_v27 }
 0x7cf   :  { %1809 = vmatprep.subr.bf16.mxu1 %v1899_v6 }
 0x7d2   :  { %1810 = vmatpush3.bf16.msra.mxu1 %v1899_v6 }
 0x7d3   :  { %1811 = vmatprep.subr.bf16.mxu1 %v1900_v28 }
 0x7d6   :  { %1812 = vmatpush3.bf16.msra.mxu1 %v1900_v28 }
 0x7d7   :  { %1813 = vmatprep.subr.bf16.mxu1 %v1901_v7 }
 0x7da   :  { %1814 = vmatpush3.bf16.msra.mxu1 %v1901_v7 }
 0x7db   :  { %1815 = vmatprep.subr.bf16.mxu1 %v1902_v8 }
 0x7de   :  { %1816 = vmatpush3.bf16.msra.mxu1 %v1902_v8 }
 0x7df   :  { %1817 = vmatprep.subr.bf16.mxu1 %v1903_v9 }
 0x7e2   :  { %1818 = vmatpush3.bf16.msra.mxu1 %v1903_v9 }
 0x7e3   :  { %1819 = vmatprep.subr.bf16.mxu1 %v1904_v10 }
 0x7e6   :  { %1820 = vmatpush3.bf16.msra.mxu1 %v1904_v10 }
 0x7e7   :  { %1821 = vmatprep.subr.bf16.mxu1 %v1905_v12 }
 0x7ea   :  { %1822 = vmatpush3.bf16.msra.mxu1 %v1905_v12 }
 0x7ed   :  { %1824 = vmatmul.mubr.bf16.vlgmr.msra.gmra.mrb[28].mxu1 %v1907_v13 }
 0x8c0   :  { %v1825_v18 = vpop.f32.mrb[28].mxu1 }
 0x8c1   :  { %v1336_v23 = vadd.f32 %v1825_v18, %v1489_v17  ;;  %v1312_v24 = vpop.f32.mrb[29].mxu1 }
 0x8c2   :  { %v1334_v25 = vadd.f32 %v1489_v17, %v1312_v24  ;;  %v1826_v29 = vpop.f32.mrb[30].mxu1 }
 0x8c3   :  { %v1337_v30 = vadd.f32 %v1826_v29, %v1489_v17  ;;  %v1315_v31 = vpop.f32.mrb[31].mxu1  ;;  %v1340_v33 = vmax.f32 %v1336_v23, 0.0 }
 0x8c4   :  { %v1335_v32 = vadd.f32 %v1489_v17, %v1315_v31  ;;  %v1338_v34 = vmax.f32 %v1334_v25, 0.0 }
 0x8c5   :  { %v1341_v35 = vmax.f32 %v1337_v30, 0.0 }
 0x8c6   :  { %v1339_v36 = vmax.f32 %v1335_v32, 0.0 }
 0x8c7   :  { %v1345_v37 = vpack.c.bf16 %v1341_v35, %v1340_v33 }
 0x8c8   :  { %v1344_v38 = vpack.c.bf16 %v1339_v36, %v1338_v34 }
 0x8ca   :  { %1828 = vmatpush3.bf16.msra.mxu0 %v1344_v38 }
 0x8cb   :  { %1829 = vmatprep.subr.bf16.mxu0 %v2081_v0 }
 0x8ce   :  { %1830 = vmatpush3.bf16.msra.mxu0 %v1345_v37 }
 0x8d1   :  { %1832 = vmatmul.mubr.msk.bf16.vlgmr.msra.gmra.mrb[24].mxu0 %vm465_vm2, %v1908_v39 }
 0x9a4   :  { %v1388_v41 = vpop.f32.mrb[24].mxu0 }
 0x9a5   :  { %v1407_v42 = vmul.f32 %v1400_v40, %v1388_v41  ;;  %v1833_v43 = vpop.f32.mrb[25].mxu0 }
 0x9a6   :  { %v1391_v11 = vpop.f32.mrb[26].mxu0 }
 0x9a7   :  { %1409 = vst [vmem:[#allocation13] sm:$0xff] %v1407_v42  ;;  %v1408_v45 = vmul.f32 %v1405_v44, %v1391_v11  ;;  %v1834_v46 = vpop.f32.mrb[27].mxu0 }
 0x9a9   :  { %1410 = vst [vmem:[#allocation13 + $0x8] sm:$0xff] %v1408_v45 }
 0x9aa   :  { %2052 = shalt.err (!%p2049_p10)
}
 0x9ab   :  { %s2053_s18 = scalar_lea.hbm %s2581_s14, 256 }
 0x9ac   :  { %p2054_p11 = scmp.ne.s32.totalorder %s2581_s14, %s2053_s18  ;;  %p2057_p12 = scmp.lt.u32.totalorder %s2053_s18, %s2581_s14 }
 0x9ae   :  { %p2059_p13 = pnand %p2057_p12, %p2054_p11 }
 0x9b0   :  { %2062 = shalt.err (!%p2059_p13)
}
 0x9b1   :  { %s2085_s0 = smov 128   ;;  %s2086_s9 = smov 8  }
 0x9b2   :  { %1422 = dma.vmem_to_hbm [thread:$0]  %s1417_s8, 256, %s2581_s14, [#allocation4], %s2085_s0, %s2085_s0, %s2086_s9  }
 0x9b3   :  { %2071 = dma.done.wait [#allocation4], 256  }
 0x9b4   :  { %2072 = vsyncadd [#allocation4], 4294967040 }
 0x9b5   :  { %1426 = vsyncpa [#allocation3], 1 }
 0x9b6   :  { %1427 = vsyncpa [#allocation6], 1 }
 0x9b7   :  { %1428 = vsyncpa [#allocation9], 1 }
 0x9b8   :  { %1429 = vsyncpa [#allocation12], 1 }
 0x9b9   :  { %1430 = vsyncpa [#allocation4], 1 }

</bundles_post_ra>
